<compile_context>
chip_gen: v6e
topology: v6e:2x2x1
jax: 0.10.0
libtpu: 0.0.40
codegen_flags: <defaults>
</compile_context>

<pallas_src>
import functools

import jax
import jax.numpy as jnp
from jax.experimental import pallas as pl
from jax.experimental.pallas import tpu as pltpu


def _round_up(x, m):
    return (x + m - 1) // m * m


def _hardswish(x):
    # relu6(x + 3) / 6 * x
    return jnp.clip(x + 3.0, 0.0, 6.0) * (1.0 / 6.0) * x


def qnet_twin_kernel(s_ref,
                     w0_ref, b0_ref,
                     wa_ref, b1_ref,
                     wb_ref, b2_ref,
                     wc_ref, bq_ref,
                     out_ref):
    f32 = jnp.float32
    bf16 = jnp.bfloat16

    # Static padded dims, derived from the bias refs.
    Mp = b1_ref.shape[-1]           # padded mid_dim
    D2p = b2_ref.shape[-1]          # padded 2*mid_dim
    Ap2 = bq_ref.shape[-1]          # 2 * padded action_dim (both heads fused)
    Ap = Ap2 // 2

    # --- trunk: Linear(S, M) + ReLU (bf16 MXU operands, f32 accumulate/elementwise) ---
    x1 = jnp.dot(s_ref[...], w0_ref[...], preferred_element_type=f32)
    x1 = jnp.maximum(x1 + b0_ref[...], 0.0)                       # (TB, Mp) f32
    x1b = x1.astype(bf16)

    # --- everything fed by x1 in one wide dot: [W1 | W2a | Wq1a | Wq2a] ---
    ya = jnp.dot(x1b, wa_ref[...], preferred_element_type=f32)    # (TB, Mp + D2p + 2Ap)

    # DenseNet.dense1: Linear(M, M) + HardSwish
    d1 = _hardswish(ya[:, :Mp] + b1_ref[...])                     # (TB, Mp) f32
    d1b = d1.astype(bf16)

    # --- everything fed by d1 in one wide dot: [W2b | Wq1b | Wq2b] ---
    yb = jnp.dot(d1b, wb_ref[...], preferred_element_type=f32)    # (TB, D2p + 2Ap)

    # DenseNet.dense2: Linear(2M, 2M) on [x1, d1] -- concat-free (row-split W2)
    d2 = _hardswish(ya[:, Mp:Mp + D2p] + yb[:, :D2p] + b2_ref[...])   # (TB, D2p) f32
    d2b = d2.astype(bf16)

    # --- both Q heads' d2 contribution in one dot: [Wq1c | Wq2c] ---
    yc = jnp.dot(d2b, wc_ref[...], preferred_element_type=f32)    # (TB, 2Ap)

    # Heads: Linear(4M, A) on [x1, d1, d2] -- concat-free (row-split, column-fused heads)
    q = ya[:, Mp + D2p:] + yb[:, D2p:] + yc + bq_ref[...]         # (TB, 2Ap)
    out_ref[...] = jnp.minimum(q[:, :Ap], q[:, Ap:]).astype(out_ref.dtype)


def prepare_params(params, state_dim, mid_dim, action_dim):
    """Pad to lane tiles, split concat-consuming weights by rows, fuse all weights that
    share an LHS activation column-wise, cast weights to bf16.

    Zero padding of weight rows/cols and biases guarantees padded activation lanes stay
    exactly 0 (relu(0)=0, hardswish(0)=0), so padding never contaminates real outputs.
    """
    (w0, b0, w1, b1, w2, b2, wq1, bq1, wq2, bq2) = params
    S, M, A = state_dim, mid_dim, action_dim
    Sp = _round_up(S, 128)
    Mp = _round_up(M, 128)
    D2p = _round_up(2 * M, 128)
    Ap = _round_up(A, 128)

    def padw(w, r, c):
        return jnp.pad(w, ((0, r - w.shape[0]), (0, c - w.shape[1]))).astype(jnp.bfloat16)

    def padb(b, c):
        return jnp.pad(b, ((0, 0), (0, c - b.shape[1]))).astype(jnp.float32)

    # Trunk.
    w0p, b0p = padw(w0, Sp, Mp), padb(b0, Mp)

    # Row-split the concat-consuming weights, then column-fuse per LHS activation.
    w1p = padw(w1, Mp, Mp)
    w2a, w2b = padw(w2[:M], Mp, D2p), padw(w2[M:], Mp, D2p)
    wq1a, wq1b, wq1c = (padw(wq1[:M], Mp, Ap), padw(wq1[M:2 * M], Mp, Ap),
                        padw(wq1[2 * M:], D2p, Ap))
    wq2a, wq2b, wq2c = (padw(wq2[:M], Mp, Ap), padw(wq2[M:2 * M], Mp, Ap),
                        padw(wq2[2 * M:], D2p, Ap))

    wa = jnp.concatenate([w1p, w2a, wq1a, wq2a], axis=1)   # (Mp,  Mp + D2p + 2Ap)
    wb = jnp.concatenate([w2b, wq1b, wq2b], axis=1)        # (Mp,  D2p + 2Ap)
    wc = jnp.concatenate([wq1c, wq2c], axis=1)             # (D2p, 2Ap)

    b1p, b2p = padb(b1, Mp), padb(b2, D2p)
    bqp = jnp.concatenate([padb(bq1, Ap), padb(bq2, Ap)], axis=1)   # (1, 2Ap)

    return (w0p, b0p, wa, b1p, wb, b2p, wc, bqp)


@functools.partial(jax.jit, static_argnames=("action_dim",))
def qnet_twin_forward(s, prepped, *, action_dim):
    (w0p, _b0p, wa, _b1p, wb, _b2p, wc, bqp) = prepped
    B, S = s.shape
    Sp, Mp = w0p.shape
    Na = wa.shape[1]
    Nb = wb.shape[1]
    D2p, Nc = wc.shape
    Ap = bqp.shape[1] // 2

    # Batch tiling: sublane-aligned tile, capped so VMEM stays comfortable on v7x (64 MiB).
    TB = 256 if B > 256 else _round_up(B, 8)
    Bp = _round_up(B, TB)

    # Pad the input batch/features and cast to bf16 for the MXU.
    s_p = jnp.pad(s, ((0, Bp - B), (0, Sp - S))).astype(jnp.bfloat16)

    batched = lambda i: (i, 0)     # streamed over the batch grid
    resident = lambda i: (0, 0)    # weights/biases stay put in VMEM across grid steps
    w_specs = [pl.BlockSpec(w.shape, resident) for w in prepped]

    # Advisory cost hint for the XLA scheduler.
    flops = 2 * Bp * (Sp * Mp + Mp * Na + Mp * Nb + D2p * Nc)
    bytes_accessed = (int(s_p.size) * 2
                      + sum(int(w.size) * w.dtype.itemsize for w in prepped)
                      + Bp * Ap * 4)

    out = pl.pallas_call(
        qnet_twin_kernel,
        out_shape=jax.ShapeDtypeStruct((Bp, Ap), jnp.float32),
        grid=(Bp // TB,),
        in_specs=[pl.BlockSpec((TB, Sp), batched)] + w_specs,
        out_specs=pl.BlockSpec((TB, Ap), batched),
        compiler_params=pltpu.CompilerParams(
            dimension_semantics=("parallel",),
            vmem_limit_bytes=32 * 1024 * 1024,
        ),
        cost_estimate=pl.CostEstimate(
            flops=flops, transcendentals=0, bytes_accessed=bytes_accessed),
    )(s_p, *prepped)

    return out[:B, :action_dim]


def _orthogonal(key, rows, cols, gain):
    """Deterministic orthogonal init (torch.nn.init.orthogonal_ semantics)."""
    n = max(rows, cols)
    a = jax.random.normal(key, (n, n), dtype=jnp.float32)
    q, r = jnp.linalg.qr(a)
    q = q * jnp.sign(jnp.diag(r))[None, :]
    return gain * q[:rows, :cols]


def make_params(key, state_dim, mid_dim, action_dim):
    """Unpadded (in, out)-layout weights + (1, out) biases, deterministically."""
    k0, k1, k2, k3, k4 = jax.random.split(key, 5)
    bias_const = 1e-6
    M = mid_dim

    # net[0]: Linear(state_dim, M) — default torch init in the module; any
    # deterministic init is fine for this synthetic kernel test.
    w0 = _orthogonal(k0, state_dim, M, 1.0)
    b0 = jnp.zeros((1, M), jnp.float32)

    # DenseNet.dense1 / dense2: layer_norm() -> orthogonal std=1.0, bias=1e-6.
    w1 = _orthogonal(k1, M, M, 1.0)
    b1 = jnp.full((1, M), bias_const, jnp.float32)
    w2 = _orthogonal(k2, 2 * M, 2 * M, 1.0)
    b2 = jnp.full((1, 2 * M), bias_const, jnp.float32)

    # net_q1 / net_q2: Linear(4M, action_dim) — default torch init in the module.
    wq1 = _orthogonal(k3, 4 * M, action_dim, 1.0)
    bq1 = jnp.zeros((1, action_dim), jnp.float32)
    wq2 = _orthogonal(k4, 4 * M, action_dim, 1.0)
    bq2 = jnp.zeros((1, action_dim), jnp.float32)

    return (w0, b0, w1, b1, w2, b2, wq1, bq1, wq2, bq2)


def reference_forward(s, params):
    """Pure-JAX reference with the module's concat structure (bf16 MXU operands,
    f32 accumulation, f32 elementwise) — validates the fused/padded kernel."""
    (w0, b0, w1, b1, w2, b2, wq1, bq1, wq2, bq2) = params

    def mm(x, w):
        return jnp.dot(x.astype(jnp.bfloat16), w.astype(jnp.bfloat16),
                       preferred_element_type=jnp.float32)

    x1 = jnp.maximum(mm(s, w0) + b0, 0.0)
    d1 = _hardswish(mm(x1, w1) + b1)
    x2 = jnp.concatenate([x1, d1], axis=1)
    d2 = _hardswish(mm(x2, w2) + b2)
    x3 = jnp.concatenate([x2, d2], axis=1)
    q1 = mm(x3, wq1) + bq1
    q2 = mm(x3, wq2) + bq2
    return jnp.minimum(q1, q2)


if __name__ == "__main__":
    batch, state_dim, mid_dim, action_dim = 8, 16, 32, 4

    key = jax.random.PRNGKey(0)
    k_s, k_p = jax.random.split(key)
    s = jax.random.normal(k_s, (batch, state_dim), dtype=jnp.float32)
    params = make_params(k_p, state_dim, mid_dim, action_dim)

    prepped = prepare_params(params, state_dim, mid_dim, action_dim)
    q = qnet_twin_forward(s, prepped, action_dim=action_dim)
    q = jax.block_until_ready(q)

    q_ref = reference_forward(s, params)
    assert q.shape == (batch, action_dim)
    assert jnp.allclose(q, q_ref, atol=2e-3, rtol=2e-3), float(jnp.max(jnp.abs(q - q_ref)))

    print("KERNEL_OK")
</pallas_src>

<mosaic_0001>
module attributes {stable_mosaic.version = 11 : i64} {
  func.func @qnet_twin_kernel(%arg0: i32, %arg1: memref<8x128xbf16, #tpu.memory_space<vmem>>, %arg2: memref<128x128xbf16, #tpu.memory_space<vmem>>, %arg3: memref<1x128xf32, #tpu.memory_space<vmem>>, %arg4: memref<128x512xbf16, #tpu.memory_space<vmem>>, %arg5: memref<1x128xf32, #tpu.memory_space<vmem>>, %arg6: memref<128x384xbf16, #tpu.memory_space<vmem>>, %arg7: memref<1x128xf32, #tpu.memory_space<vmem>>, %arg8: memref<128x256xbf16, #tpu.memory_space<vmem>>, %arg9: memref<1x256xf32, #tpu.memory_space<vmem>>, %arg10: memref<8x128xf32, #tpu.memory_space<vmem>>) attributes {dimension_semantics = [#tpu.dimension_semantics<parallel>], iteration_bounds = array<i64: 1>, scalar_prefetch = 0 : i64, scratch_operands = 0 : i64, tpu.core_type = #tpu.core_type<tc>, window_params = [{transform_indices = @transform_0, window_bounds = array<i64: 8, 128>}, {pipeline_mode = #tpu.pipeline_mode<synchronous>, transform_indices = @transform_1, window_bounds = array<i64: 128, 128>}, {pipeline_mode = #tpu.pipeline_mode<synchronous>, transform_indices = @transform_2, window_bounds = array<i64: 1, 128>}, {pipeline_mode = #tpu.pipeline_mode<synchronous>, transform_indices = @transform_3, window_bounds = array<i64: 128, 512>}, {pipeline_mode = #tpu.pipeline_mode<synchronous>, transform_indices = @transform_4, window_bounds = array<i64: 1, 128>}, {pipeline_mode = #tpu.pipeline_mode<synchronous>, transform_indices = @transform_5, window_bounds = array<i64: 128, 384>}, {pipeline_mode = #tpu.pipeline_mode<synchronous>, transform_indices = @transform_6, window_bounds = array<i64: 1, 128>}, {pipeline_mode = #tpu.pipeline_mode<synchronous>, transform_indices = @transform_7, window_bounds = array<i64: 128, 256>}, {pipeline_mode = #tpu.pipeline_mode<synchronous>, transform_indices = @transform_8, window_bounds = array<i64: 1, 256>}, {transform_indices = @transform_9, window_bounds = array<i64: 8, 128>}]} {
    %c0 = arith.constant 0 : index
    %c0_0 = arith.constant 0 : index
    %0 = vector.load %arg1[%c0, %c0_0] : memref<8x128xbf16, #tpu.memory_space<vmem>>, vector<8x128xbf16>
    %c0_1 = arith.constant 0 : index
    %c0_2 = arith.constant 0 : index
    %1 = vector.load %arg2[%c0_1, %c0_2] : memref<128x128xbf16, #tpu.memory_space<vmem>>, vector<128x128xbf16>
    %cst = arith.constant dense<0.000000e+00> : vector<8x128xf32>
    %2 = tpu.matmul %0, %1, %cst {dimension_numbers = #tpu.dot_dimension_numbers<[1], [0], [0], [1], [0, 0, 1, 1], [], []>} : vector<8x128xbf16>, vector<128x128xbf16>, vector<8x128xf32> -> vector<8x128xf32>
    %c0_3 = arith.constant 0 : index
    %c0_4 = arith.constant 0 : index
    %3 = vector.load %arg3[%c0_3, %c0_4] : memref<1x128xf32, #tpu.memory_space<vmem>>, vector<1x128xf32>
    %4 = vector.broadcast %3 : vector<1x128xf32> to vector<8x128xf32>
    %5 = arith.addf %2, %4 : vector<8x128xf32>
    %cst_5 = arith.constant 0.000000e+00 : f32
    %6 = vector.broadcast %cst_5 : f32 to vector<8x128xf32>
    %7 = arith.maximumf %5, %6 : vector<8x128xf32>
    %8 = arith.truncf %7 : vector<8x128xf32> to vector<8x128xbf16>
    %c0_6 = arith.constant 0 : index
    %c0_7 = arith.constant 0 : index
    %9 = vector.load %arg4[%c0_6, %c0_7] : memref<128x512xbf16, #tpu.memory_space<vmem>>, vector<128x512xbf16>
    %cst_8 = arith.constant dense<0.000000e+00> : vector<8x512xf32>
    %10 = tpu.matmul %8, %9, %cst_8 {dimension_numbers = #tpu.dot_dimension_numbers<[1], [0], [0], [1], [0, 0, 1, 1], [], []>} : vector<8x128xbf16>, vector<128x512xbf16>, vector<8x512xf32> -> vector<8x512xf32>
    %11 = vector.extract_strided_slice %10 {offsets = [0, 0], sizes = [8, 128], strides = [1, 1]} : vector<8x512xf32> to vector<8x128xf32>
    %c0_9 = arith.constant 0 : index
    %c0_10 = arith.constant 0 : index
    %12 = vector.load %arg5[%c0_9, %c0_10] : memref<1x128xf32, #tpu.memory_space<vmem>>, vector<1x128xf32>
    %13 = vector.broadcast %12 : vector<1x128xf32> to vector<8x128xf32>
    %14 = arith.addf %11, %13 : vector<8x128xf32>
    %cst_11 = arith.constant 3.000000e+00 : f32
    %15 = vector.broadcast %cst_11 : f32 to vector<8x128xf32>
    %16 = arith.addf %14, %15 : vector<8x128xf32>
    %cst_12 = arith.constant 0.000000e+00 : f32
    %cst_13 = arith.constant 6.000000e+00 : f32
    %17 = vector.broadcast %cst_12 : f32 to vector<8x128xf32>
    %18 = arith.maximumf %17, %16 : vector<8x128xf32>
    %19 = vector.broadcast %cst_13 : f32 to vector<8x128xf32>
    %20 = arith.minimumf %19, %18 : vector<8x128xf32>
    %cst_14 = arith.constant 0.166666672 : f32
    %21 = vector.broadcast %cst_14 : f32 to vector<8x128xf32>
    %22 = arith.mulf %20, %21 : vector<8x128xf32>
    %23 = arith.mulf %22, %14 : vector<8x128xf32>
    %24 = arith.truncf %23 : vector<8x128xf32> to vector<8x128xbf16>
    %c0_15 = arith.constant 0 : index
    %c0_16 = arith.constant 0 : index
    %25 = vector.load %arg6[%c0_15, %c0_16] : memref<128x384xbf16, #tpu.memory_space<vmem>>, vector<128x384xbf16>
    %cst_17 = arith.constant dense<0.000000e+00> : vector<8x384xf32>
    %26 = tpu.matmul %24, %25, %cst_17 {dimension_numbers = #tpu.dot_dimension_numbers<[1], [0], [0], [1], [0, 0, 1, 1], [], []>} : vector<8x128xbf16>, vector<128x384xbf16>, vector<8x384xf32> -> vector<8x384xf32>
    %27 = vector.extract_strided_slice %10 {offsets = [0, 128], sizes = [8, 128], strides = [1, 1]} : vector<8x512xf32> to vector<8x128xf32>
    %28 = vector.extract_strided_slice %26 {offsets = [0, 0], sizes = [8, 128], strides = [1, 1]} : vector<8x384xf32> to vector<8x128xf32>
    %29 = arith.addf %27, %28 : vector<8x128xf32>
    %c0_18 = arith.constant 0 : index
    %c0_19 = arith.constant 0 : index
    %30 = vector.load %arg7[%c0_18, %c0_19] : memref<1x128xf32, #tpu.memory_space<vmem>>, vector<1x128xf32>
    %31 = vector.broadcast %30 : vector<1x128xf32> to vector<8x128xf32>
    %32 = arith.addf %29, %31 : vector<8x128xf32>
    %cst_20 = arith.constant 3.000000e+00 : f32
    %33 = vector.broadcast %cst_20 : f32 to vector<8x128xf32>
    %34 = arith.addf %32, %33 : vector<8x128xf32>
    %cst_21 = arith.constant 0.000000e+00 : f32
    %cst_22 = arith.constant 6.000000e+00 : f32
    %35 = vector.broadcast %cst_21 : f32 to vector<8x128xf32>
    %36 = arith.maximumf %35, %34 : vector<8x128xf32>
    %37 = vector.broadcast %cst_22 : f32 to vector<8x128xf32>
    %38 = arith.minimumf %37, %36 : vector<8x128xf32>
    %cst_23 = arith.constant 0.166666672 : f32
    %39 = vector.broadcast %cst_23 : f32 to vector<8x128xf32>
    %40 = arith.mulf %38, %39 : vector<8x128xf32>
    %41 = arith.mulf %40, %32 : vector<8x128xf32>
    %42 = arith.truncf %41 : vector<8x128xf32> to vector<8x128xbf16>
    %c0_24 = arith.constant 0 : index
    %c0_25 = arith.constant 0 : index
    %43 = vector.load %arg8[%c0_24, %c0_25] : memref<128x256xbf16, #tpu.memory_space<vmem>>, vector<128x256xbf16>
    %cst_26 = arith.constant dense<0.000000e+00> : vector<8x256xf32>
    %44 = tpu.matmul %42, %43, %cst_26 {dimension_numbers = #tpu.dot_dimension_numbers<[1], [0], [0], [1], [0, 0, 1, 1], [], []>} : vector<8x128xbf16>, vector<128x256xbf16>, vector<8x256xf32> -> vector<8x256xf32>
    %45 = vector.extract_strided_slice %10 {offsets = [0, 256], sizes = [8, 256], strides = [1, 1]} : vector<8x512xf32> to vector<8x256xf32>
    %46 = vector.extract_strided_slice %26 {offsets = [0, 128], sizes = [8, 256], strides = [1, 1]} : vector<8x384xf32> to vector<8x256xf32>
    %47 = arith.addf %45, %46 : vector<8x256xf32>
    %48 = arith.addf %47, %44 : vector<8x256xf32>
    %c0_27 = arith.constant 0 : index
    %c0_28 = arith.constant 0 : index
    %49 = vector.load %arg9[%c0_27, %c0_28] : memref<1x256xf32, #tpu.memory_space<vmem>>, vector<1x256xf32>
    %50 = vector.broadcast %49 : vector<1x256xf32> to vector<8x256xf32>
    %51 = arith.addf %48, %50 : vector<8x256xf32>
    %52 = vector.extract_strided_slice %51 {offsets = [0, 0], sizes = [8, 128], strides = [1, 1]} : vector<8x256xf32> to vector<8x128xf32>
    %53 = vector.extract_strided_slice %51 {offsets = [0, 128], sizes = [8, 128], strides = [1, 1]} : vector<8x256xf32> to vector<8x128xf32>
    %54 = arith.minimumf %52, %53 : vector<8x128xf32>
    %c0_29 = arith.constant 0 : index
    %c0_30 = arith.constant 0 : index
    %55 = vector.load %arg10[%c0_29, %c0_30] : memref<8x128xf32, #tpu.memory_space<vmem>>, vector<8x128xf32>
    tpu.vector_store %arg10[%c0_29, %c0_30], %54 {strides = array<i32>} : memref<8x128xf32, #tpu.memory_space<vmem>>, vector<8x128xf32>,
    return
  }
  func.func @transform_0(%arg0: i32) -> (i32, i32) {
    %c0_i32 = arith.constant 0 : i32
    %c0_i32_0 = arith.constant 0 : i32
    return %arg0, %c0_i32 : i32, i32
  }
  func.func @transform_1(%arg0: i32) -> (i32, i32) {
    %c0_i32 = arith.constant 0 : i32
    %c0_i32_0 = arith.constant 0 : i32
    %c0_i32_1 = arith.constant 0 : i32
    return %c0_i32, %c0_i32_0 : i32, i32
  }
  func.func @transform_2(%arg0: i32) -> (i32, i32) {
    %c0_i32 = arith.constant 0 : i32
    %c0_i32_0 = arith.constant 0 : i32
    %c0_i32_1 = arith.constant 0 : i32
    return %c0_i32, %c0_i32_0 : i32, i32
  }
  func.func @transform_3(%arg0: i32) -> (i32, i32) {
    %c0_i32 = arith.constant 0 : i32
    %c0_i32_0 = arith.constant 0 : i32
    %c0_i32_1 = arith.constant 0 : i32
    return %c0_i32, %c0_i32_0 : i32, i32
  }
  func.func @transform_4(%arg0: i32) -> (i32, i32) {
    %c0_i32 = arith.constant 0 : i32
    %c0_i32_0 = arith.constant 0 : i32
    %c0_i32_1 = arith.constant 0 : i32
    return %c0_i32, %c0_i32_0 : i32, i32
  }
  func.func @transform_5(%arg0: i32) -> (i32, i32) {
    %c0_i32 = arith.constant 0 : i32
    %c0_i32_0 = arith.constant 0 : i32
    %c0_i32_1 = arith.constant 0 : i32
    return %c0_i32, %c0_i32_0 : i32, i32
  }
  func.func @transform_6(%arg0: i32) -> (i32, i32) {
    %c0_i32 = arith.constant 0 : i32
    %c0_i32_0 = arith.constant 0 : i32
    %c0_i32_1 = arith.constant 0 : i32
    return %c0_i32, %c0_i32_0 : i32, i32
  }
  func.func @transform_7(%arg0: i32) -> (i32, i32) {
    %c0_i32 = arith.constant 0 : i32
    %c0_i32_0 = arith.constant 0 : i32
    %c0_i32_1 = arith.constant 0 : i32
    return %c0_i32, %c0_i32_0 : i32, i32
  }
  func.func @transform_8(%arg0: i32) -> (i32, i32) {
    %c0_i32 = arith.constant 0 : i32
    %c0_i32_0 = arith.constant 0 : i32
    %c0_i32_1 = arith.constant 0 : i32
    return %c0_i32, %c0_i32_0 : i32, i32
  }
  func.func @transform_9(%arg0: i32) -> (i32, i32) {
    %c0_i32 = arith.constant 0 : i32
    %c0_i32_0 = arith.constant 0 : i32
    return %arg0, %c0_i32 : i32, i32
  }
}

</mosaic_0001>

<bundles_post_ra>
// kernel: qnet_twin_forward.1
= control target key start
LH: loop header
LB: loop body
LE: loop exit
PB: predicated region body
PF: predicated region fallthrough
CT: control target
= control target key end

     0   :  { %14 = vsyncpa [#allocation3], 0  ;;  %s1389_s0 = inlined_call_operand.vmem [shape: bf16[8,128], index: 0, kind: input, shape index: {}]   ;;  %s1390_s1 = inlined_call_operand.hbm [shape: bf16[128,128], index: 1, kind: input, shape index: {}]   ;;  %s1391_s2 = inlined_call_operand.vmem [shape: f32[1,128], index: 2, kind: input, shape index: {}]   ;;  %s1392_s3 = inlined_call_operand.hbm [shape: bf16[128,512], index: 3, kind: input, shape index: {}]   ;;  %s1393_s4 = inlined_call_operand.vmem [shape: f32[1,128], index: 4, kind: input, shape index: {}]   ;;  %s1394_s5 = inlined_call_operand.hbm [shape: bf16[128,384], index: 5, kind: input, shape index: {}]   ;;  %s1395_s6 = inlined_call_operand.vmem [shape: f32[1,128], index: 6, kind: input, shape index: {}]   ;;  %s1396_s7 = inlined_call_operand.hbm [shape: bf16[128,256], index: 7, kind: input, shape index: {}]   ;;  %s1397_s8 = inlined_call_operand.vmem [shape: f32[1,256], index: 8, kind: input, shape index: {}]   ;;  %s1398_s9 = inlined_call_operand.vmem [shape: f32[8,128], index: 9, kind: output, shape index: {}]  }
   0x1   :  { %15 = vsyncpa [#allocation5], 0 }
   0x2   :  { %16 = vsyncpa [#allocation8], 0  ;;  %s1264_s30 = smov [#allocation4]  }
   0x3   :  { %s38_s10 = sshll.u32 %s1264_s30, 4  ;;  %s39_s10 = int_to_ptr.vmem [resolvable:$true] %s38_s10 }
   0x4   :  { %s1186_s11 = scalar_lea.vmem %s39_s10, 4096  ;;  %p1191_p1 = scmp.lt.s32.totalorder %s39_s10, %s39_s10 }
   0x5   :  { %p1187_p0 = scmp.ne.s32.totalorder %s39_s10, %s1186_s11  ;;  %p1192_p2 = scmp.lt.s32.totalorder %s1186_s11, %s1186_s11 }
   0x7   :  { %p1193_p3 = por %p1192_p2, %p1191_p1 }
   0x9   :  { %p1194_p4 = pnand %p1193_p3, %p1187_p0 }
   0xb   :  { %1197 = shalt.err (!%p1194_p4)
}
   0xc   :  { %s1265_s12 = smov 256   ;;  %s1266_s13 = smov 16  }
   0xd   :  { %44 = dma.hbm_to_vmem [thread:$0]  %s1392_s3, 4096, %s39_s10, [#allocation5], %s1265_s12, %s1265_s12, %s1266_s13  }
   0xe   :  { %s1267_s16 = smov [#allocation2]  }
   0xf   :  { %s24_s17 = sshll.u32 %s1267_s16, 4  ;;  %s25_s17 = int_to_ptr.vmem [resolvable:$true] %s24_s17 }
  0x10   :  { %s1206_s18 = scalar_lea.vmem %s25_s17, 1024  ;;  %p1211_p6 = scmp.lt.s32.totalorder %s25_s17, %s25_s17 }
  0x11   :  { %p1207_p5 = scmp.ne.s32.totalorder %s25_s17, %s1206_s18  ;;  %p1212_p7 = scmp.lt.s32.totalorder %s1206_s18, %s1206_s18 }
  0x13   :  { %p1213_p8 = por %p1212_p7, %p1211_p6 }
  0x15   :  { %p1214_p9 = pnand %p1213_p8, %p1207_p5 }
  0x17   :  { %1217 = shalt.err (!%p1214_p9)
}
  0x18   :  { %s1268_s19 = smov 64   ;;  %s1269_s20 = smov 4  }
  0x19   :  { %30 = dma.hbm_to_vmem [thread:$0]  %s1390_s1, 1024, %s25_s17, [#allocation3], %s1268_s19, %s1268_s19, %s1269_s20  }
  0x1a   :  { %s1270_s23 = smov [#allocation6]  }
  0x1b   :  { %s52_s24 = sshll.u32 %s1270_s23, 4  ;;  %s53_s24 = int_to_ptr.vmem [resolvable:$true] %s52_s24 }
  0x1c   :  { %s1226_s3 = scalar_lea.vmem %s53_s24, 3072  ;;  %p1231_p11 = scmp.lt.s32.totalorder %s53_s24, %s53_s24 }
  0x1d   :  { %p1227_p10 = scmp.ne.s32.totalorder %s53_s24, %s1226_s3  ;;  %p1232_p12 = scmp.lt.s32.totalorder %s1226_s3, %s1226_s3 }
  0x1f   :  { %p1233_p13 = por %p1232_p12, %p1231_p11 }
  0x21   :  { %p1234_p0 = pnand %p1233_p13, %p1227_p10 }
  0x23   :  { %1237 = shalt.err (!%p1234_p0)
}
  0x24   :  { %s1271_s25 = smov 192   ;;  %s1272_s26 = smov 12  }
  0x25   :  { %58 = dma.hbm_to_vmem [thread:$0]  %s1394_s5, 3072, %s53_s24, [#allocation5], %s1271_s25, %s1271_s25, %s1272_s26  }
  0x26   :  { %s1273_s29 = smov [#allocation7]  }
  0x27   :  { %s66_s30 = sshll.u32 %s1273_s29, 4  ;;  %s67_s30 = int_to_ptr.vmem [resolvable:$true] %s66_s30 }
  0x28   :  { %s1246_s1 = scalar_lea.vmem %s67_s30, 2048  ;;  %p1251_p2 = scmp.lt.s32.totalorder %s67_s30, %s67_s30 }
  0x29   :  { %p1247_p1 = scmp.ne.s32.totalorder %s67_s30, %s1246_s1  ;;  %p1252_p3 = scmp.lt.s32.totalorder %s1246_s1, %s1246_s1 }
  0x2b   :  { %p1253_p4 = por %p1252_p3, %p1251_p2 }
  0x2d   :  { %p1254_p5 = pnand %p1253_p4, %p1247_p1 }
  0x2f   :  { %1257 = shalt.err (!%p1254_p5)
}
  0x30   :  { %s1274_s10 = smov 128   ;;  %s1275_s11 = smov 8  }
  0x31   :  { %72 = dma.hbm_to_vmem [thread:$0]  %s1396_s7, 2048, %s67_s30, [#allocation8], %s1274_s10, %s1274_s10, %s1275_s11  }
  0x32   :  { %1258 = dma.done.wait [#allocation3], 1024  }
  0x33   :  { %1259 = vsyncadd [#allocation3], 4294966272 }
  0x34   :  { %1260 = dma.done.wait [#allocation5], 7168  }
  0x35   :  { %1261 = vsyncadd [#allocation5], 4294960128 }
  0x36   :  { %1262 = dma.done.wait [#allocation8], 2048  }
  0x37   :  { %1263 = vsyncadd [#allocation8], 4294965248  ;;  %v1276_v0 = vmov 0.0   ;;  %vm1277_vm0 = vmmov 0   ;;  %v1066_v1 = vld [vmem:[#allocation2 + $0x38] sm:$0xff]   ;;  %v1067_v2 = vld [vmem:[#allocation2 + $0x30] sm:$0xff]  }
  0x38   :  { %1011 = vmatprep.subr.bf16.mxu0 %v1276_v0  ;;  %1027 = vmatprep.mubr.msk.bf16.mxu0 %vm1277_vm0, %v1276_v0  ;;  %v1068_v3 = vld [vmem:[#allocation2 + $0x28] sm:$0xff]   ;;  %v1074_v4 = vld [vmem:[#allocation4 + $0xe4] ss:$16 sps:$4 sm:$0xff]   ;;  %v1079_v6 = vld [vmem:[#allocation4 + $0xe0] ss:$16 sps:$4 sm:$0xff]   ;;  %v1278_v42 = vmov 0  }
  0x39   :  { %1012 = vmatpush3.bf16.msra.mxu0 %v1066_v1  ;;  %v1069_v5 = vld [vmem:[#allocation2 + $0x20] sm:$0xff]   ;;  %394 = vmatprep.subr.bf16.mxu1 %v1074_v4  ;;  %v1070_v8 = vld [vmem:[#allocation2 + $0x18] sm:$0xff]   ;;  %v1071_v13 = vld [vmem:[#allocation2 + $0x10] sm:$0xff]  }
  0x3a   :  { %1013 = vmatprep.subr.bf16.mxu0 %v1276_v0  ;;  %v1080_v7 = vld [vmem:[#allocation4 + $0xc4] ss:$16 sps:$4 sm:$0xff]   ;;  %395 = vmatpush1.bf16.msra.mxu1 %v1079_v6  ;;  %v1085_v9 = vld [vmem:[#allocation4 + $0xc0] ss:$16 sps:$4 sm:$0xff]   ;;  %v1072_v16 = vld [vmem:[#allocation2 + $0x8] sm:$0xff]  }
  0x3b   :  { %396 = vmatprep.subr.bf16.mxu1 %v1080_v7  ;;  %v1086_v10 = vld [vmem:[#allocation4 + $0xa4] ss:$16 sps:$4 sm:$0xff]   ;;  %v1091_v11 = vld [vmem:[#allocation4 + $0xa0] ss:$16 sps:$4 sm:$0xff]   ;;  %v1078_v20 = vld [vmem:[#allocation4 + $0xec] ss:$16 sps:$4 sm:$0xff]   ;;  %426 = vmatprep.mubr.bf16.mxu1 %v1278_v42 }
  0x3c   :  { %v1092_v12 = vld [vmem:[#allocation4 + $0x84] ss:$16 sps:$4 sm:$0xff]   ;;  %v1097_v14 = vld [vmem:[#allocation4 + $0x80] ss:$16 sps:$4 sm:$0xff]   ;;  %v1076_v24 = vld [vmem:[#allocation4 + $0xe8] ss:$16 sps:$4 sm:$0xff]  }
  0x3d   :  { %1014 = vmatpush3.bf16.msra.mxu0 %v1067_v2  ;;  %v1098_v15 = vld [vmem:[#allocation4 + $0x64] ss:$16 sps:$4 sm:$0xff]   ;;  %v1103_v17 = vld [vmem:[#allocation4 + $0x60] ss:$16 sps:$4 sm:$0xff]   ;;  %v1084_v25 = vld [vmem:[#allocation4 + $0xcc] ss:$16 sps:$4 sm:$0xff]  }
  0x3e   :  { %1015 = vmatprep.subr.bf16.mxu0 %v1276_v0  ;;  %397 = vmatpush1.bf16.msra.mxu1 %v1085_v9  ;;  %v1104_v18 = vld [vmem:[#allocation4 + $0x44] ss:$16 sps:$4 sm:$0xff]   ;;  %v1109_v21 = vld [vmem:[#allocation4 + $0x40] ss:$16 sps:$4 sm:$0xff]   ;;  %v1082_v26 = vld [vmem:[#allocation4 + $0xc8] ss:$16 sps:$4 sm:$0xff]  }
  0x3f   :  { %398 = vmatprep.subr.bf16.mxu1 %v1086_v10  ;;  %v1073_v19 = vld [vmem:[#allocation2] sm:$0xff]   ;;  %v1090_v27 = vld [vmem:[#allocation4 + $0xac] ss:$16 sps:$4 sm:$0xff]   ;;  %v1088_v28 = vld [vmem:[#allocation4 + $0xa8] ss:$16 sps:$4 sm:$0xff]  }
  0x40   :  { %v1110_v22 = vld [vmem:[#allocation4 + $0x24] ss:$16 sps:$4 sm:$0xff]   ;;  %v88_v23 = vld [vmem:[%s1389_s0] sm:$0xf]  ;;  %v1096_v29 = vld [vmem:[#allocation4 + $0x8c] ss:$16 sps:$4 sm:$0xff]  }
  0x41   :  { %1016 = vmatpush3.bf16.msra.mxu0 %v1068_v3  ;;  %v1094_v30 = vld [vmem:[#allocation4 + $0x88] ss:$16 sps:$4 sm:$0xff]   ;;  %v1102_v31 = vld [vmem:[#allocation4 + $0x6c] ss:$16 sps:$4 sm:$0xff]   ;;  %v1115_v37 = vld [vmem:[#allocation4 + $0x20] ss:$16 sps:$4 sm:$0xff]  }
  0x42   :  { %1017 = vmatprep.subr.bf16.mxu0 %v1276_v0  ;;  %399 = vmatpush1.bf16.msra.mxu1 %v1091_v11  ;;  %v1100_v32 = vld [vmem:[#allocation4 + $0x68] ss:$16 sps:$4 sm:$0xff]   ;;  %v1108_v33 = vld [vmem:[#allocation4 + $0x4c] ss:$16 sps:$4 sm:$0xff]   ;;  %v1116_v38 = vld [vmem:[#allocation4 + $0x4] ss:$16 sps:$4 sm:$0xff]  }
  0x43   :  { %400 = vmatprep.subr.bf16.mxu1 %v1092_v12  ;;  %v1106_v34 = vld [vmem:[#allocation4 + $0x48] ss:$16 sps:$4 sm:$0xff]   ;;  %v1114_v35 = vld [vmem:[#allocation4 + $0x2c] ss:$16 sps:$4 sm:$0xff]   ;;  %v1121_v41 = vld [vmem:[#allocation4] ss:$16 sps:$4 sm:$0xff]  }
  0x44   :  { %v1112_v36 = vld [vmem:[#allocation4 + $0x28] ss:$16 sps:$4 sm:$0xff]   ;;  %v1120_v39 = vld [vmem:[#allocation4 + $0xc] ss:$16 sps:$4 sm:$0xff]   ;;  %v910_v44 = vld [vmem:[%s1391_s2] ss:$0 sm:$0xff] }
  0x45   :  { %1018 = vmatpush3.bf16.msra.mxu0 %v1069_v5  ;;  %v1118_v40 = vld [vmem:[#allocation4 + $0x8] ss:$16 sps:$4 sm:$0xff]   ;;  %v1125_v51 = vld [vmem:[#allocation6 + $0xb0] ss:$12 sps:$4 sm:$0xff]   ;;  %v1128_v53 = vld [vmem:[#allocation6 + $0x94] ss:$12 sps:$4 sm:$0xff]  }
  0x46   :  { %1019 = vmatprep.subr.bf16.mxu0 %v1276_v0  ;;  %401 = vmatpush1.bf16.msra.mxu1 %v1097_v14  ;;  %v1124_v43 = vld [vmem:[#allocation6 + $0xac] ss:$12 sps:$4 sm:$0xff]   ;;  %v1122_v50 = vld [vmem:[#allocation6 + $0xa8] ss:$12 sps:$4 sm:$0xff]   ;;  %v1126_v55 = vld [vmem:[#allocation6 + $0x90] ss:$12 sps:$4 sm:$0xff]  }
  0x47   :  { %402 = vmatprep.subr.bf16.mxu1 %v1098_v15  ;;  %v1129_v56 = vld [vmem:[#allocation6 + $0x98] ss:$12 sps:$4 sm:$0xff]   ;;  %v1132_v57 = vld [vmem:[#allocation6 + $0x7c] ss:$12 sps:$4 sm:$0xff]   ;;  %v1133_v59 = vld [vmem:[#allocation6 + $0x80] ss:$12 sps:$4 sm:$0xff]  }
  0x48   :  { %v1130_v58 = vld [vmem:[#allocation6 + $0x78] ss:$12 sps:$4 sm:$0xff]   ;;  %v1134_v61 = vld [vmem:[#allocation6 + $0x60] ss:$12 sps:$4 sm:$0xff]   ;;  %v1137_v62 = vld [vmem:[#allocation6 + $0x68] ss:$12 sps:$4 sm:$0xff]  }
  0x49   :  { %1020 = vmatpush3.bf16.msra.mxu0 %v1070_v8  ;;  %v1136_v60 = vld [vmem:[#allocation6 + $0x64] ss:$12 sps:$4 sm:$0xff]   ;;  %v1140_v63 = vld [vmem:[#allocation6 + $0x4c] ss:$12 sps:$4 sm:$0xff]   ;;  %v1138_v1 = vld [vmem:[#allocation6 + $0x48] ss:$12 sps:$4 sm:$0xff]  }
  0x4a   :  { %1021 = vmatprep.subr.bf16.mxu0 %v1276_v0  ;;  %403 = vmatpush1.bf16.msra.mxu1 %v1103_v17  ;;  %v1141_v2 = vld [vmem:[#allocation6 + $0x50] ss:$12 sps:$4 sm:$0xff]   ;;  %v1144_v3 = vld [vmem:[#allocation6 + $0x34] ss:$12 sps:$4 sm:$0xff]   ;;  %v1145_v5 = vld [vmem:[#allocation6 + $0x38] ss:$12 sps:$4 sm:$0xff]  }
  0x4b   :  { %404 = vmatprep.subr.bf16.mxu1 %v1104_v18  ;;  %v1142_v4 = vld [vmem:[#allocation6 + $0x30] ss:$12 sps:$4 sm:$0xff]   ;;  %v1146_v7 = vld [vmem:[#allocation6 + $0x18] ss:$12 sps:$4 sm:$0xff]   ;;  %v1149_v8 = vld [vmem:[#allocation6 + $0x20] ss:$12 sps:$4 sm:$0xff]  }
  0x4c   :  { %v1148_v6 = vld [vmem:[#allocation6 + $0x1c] ss:$12 sps:$4 sm:$0xff]   ;;  %v1152_v9 = vld [vmem:[#allocation6 + $0x4] ss:$12 sps:$4 sm:$0xff]   ;;  %v1150_v10 = vld [vmem:[#allocation6] ss:$12 sps:$4 sm:$0xff]  }
  0x4d   :  { %1022 = vmatpush3.bf16.msra.mxu0 %v1071_v13  ;;  %v1153_v11 = vld [vmem:[#allocation6 + $0x8] ss:$12 sps:$4 sm:$0xff]   ;;  %v951_v13 = vld [vmem:[%s1393_s4] ss:$0 sm:$0xff] }
  0x4e   :  { %1023 = vmatprep.subr.bf16.mxu0 %v1276_v0  ;;  %405 = vmatpush1.bf16.msra.mxu1 %v1109_v21  ;;  %v1156_v12 = vld [vmem:[#allocation7 + $0x74] ss:$8 sps:$4 sm:$0xff]  }
  0x4f   :  { %406 = vmatprep.subr.bf16.mxu1 %v1110_v22 }
  0x51   :  { %1024 = vmatpush3.bf16.msra.mxu0 %v1072_v16 }
  0x52   :  { %1025 = vmatprep.subr.bf16.mxu0 %v1276_v0  ;;  %407 = vmatpush1.bf16.msra.mxu1 %v1115_v37  ;;  %v1171_v37 = vld [vmem:[#allocation7 + $0x24] ss:$8 sps:$4 sm:$0xff]  }
  0x53   :  { %408 = vmatprep.subr.bf16.mxu1 %v1116_v38  ;;  %v1169_v38 = vld [vmem:[#allocation7 + $0x20] ss:$8 sps:$4 sm:$0xff]  }
  0x55   :  { %1026 = vmatpush3.bf16.msra.mxu0 %v1073_v19 }
  0x56   :  { %435 = vmatprep.subr.bf16.mxu0 %v1078_v20  ;;  %409 = vmatpush1.bf16.msra.mxu1 %v1121_v41  ;;  %v1177_v41 = vld [vmem:[#allocation7 + $0x4] ss:$8 sps:$4 sm:$0xff]  }
  0x57   :  { %650 = vmatprep.subr.bf16.mxu1 %v1124_v43 }
  0x58   :  { %1028 = vmatmul.mubr.bf16.vlgmr.msra.gmra.mxu0 %v88_v23 }
  0x59   :  { %436 = vmatpush1.bf16.msra.mxu0 %v1076_v24  ;;  %467 = vmatprep.mubr.bf16.mxu0 %v1278_v42 }
  0x5a   :  { %437 = vmatprep.subr.bf16.mxu0 %v1084_v25 }
  0x5d   :  { %438 = vmatpush1.bf16.msra.mxu0 %v1082_v26 }
  0x5e   :  { %439 = vmatprep.subr.bf16.mxu0 %v1090_v27  ;;  %v1154_v27 = vld [vmem:[#allocation7 + $0x70] ss:$8 sps:$4 sm:$0xff]  }
  0x61   :  { %440 = vmatpush1.bf16.msra.mxu0 %v1088_v28 }
  0x62   :  { %441 = vmatprep.subr.bf16.mxu0 %v1096_v29  ;;  %v1159_v29 = vld [vmem:[#allocation7 + $0x64] ss:$8 sps:$4 sm:$0xff]  }
  0x65   :  { %442 = vmatpush1.bf16.msra.mxu0 %v1094_v30  ;;  %v1157_v30 = vld [vmem:[#allocation7 + $0x60] ss:$8 sps:$4 sm:$0xff]  }
  0x66   :  { %443 = vmatprep.subr.bf16.mxu0 %v1102_v31  ;;  %v1162_v31 = vld [vmem:[#allocation7 + $0x54] ss:$8 sps:$4 sm:$0xff]  }
  0x69   :  { %444 = vmatpush1.bf16.msra.mxu0 %v1100_v32  ;;  %v1160_v32 = vld [vmem:[#allocation7 + $0x50] ss:$8 sps:$4 sm:$0xff]  }
  0x6a   :  { %445 = vmatprep.subr.bf16.mxu0 %v1108_v33  ;;  %v1165_v33 = vld [vmem:[#allocation7 + $0x44] ss:$8 sps:$4 sm:$0xff]  }
  0x6d   :  { %446 = vmatpush1.bf16.msra.mxu0 %v1106_v34  ;;  %v1163_v34 = vld [vmem:[#allocation7 + $0x40] ss:$8 sps:$4 sm:$0xff]  }
  0x6e   :  { %447 = vmatprep.subr.bf16.mxu0 %v1114_v35  ;;  %v1168_v35 = vld [vmem:[#allocation7 + $0x34] ss:$8 sps:$4 sm:$0xff]  }
  0x71   :  { %448 = vmatpush1.bf16.msra.mxu0 %v1112_v36  ;;  %v1166_v36 = vld [vmem:[#allocation7 + $0x30] ss:$8 sps:$4 sm:$0xff]  }
  0x72   :  { %449 = vmatprep.subr.bf16.mxu0 %v1120_v39  ;;  %v1174_v39 = vld [vmem:[#allocation7 + $0x14] ss:$8 sps:$4 sm:$0xff]  }
  0x75   :  { %450 = vmatpush1.bf16.msra.mxu0 %v1118_v40  ;;  %v1172_v40 = vld [vmem:[#allocation7 + $0x10] ss:$8 sps:$4 sm:$0xff]  }
  0x76   :  { %1031 = vmatprep.subr.bf16.mxu0 %v1276_v0 }
 0x118   :  { %v194_v45 = vpop.f32.mrf.mxu0 }
 0x119   :  { %v195_v46 = vadd.f32 %v910_v44, %v194_v45  ;;  %v976_v44 = vld [vmem:[%s1395_s6] ss:$0 sm:$0xff] }
 0x11a   :  { %v1029_v47 = vpop.f32.mrf.mxu0 }
 0x11b   :  { %v200_v48 = vmax.f32 %v195_v46, 0.0 }
 0x11c   :  { %v197_v49 = vpop.f32.mrf.mxu0 }
 0x11d   :  { %v201_v52 = vpack.c.bf16 %v200_v48, %v200_v48 }
 0x11e   :  { %v1030_v54 = vpop.f32.mrf.mxu0 }
 0x11f   :  { %427 = vmatmul.mubr.bf16.vlgmr.msra.gmra.mxu1 %v201_v52  ;;  %468 = vmatmul.mubr.bf16.vlgmr.msra.gmra.mxu0 %v201_v52 }
 0x120   :  { %651 = vmatpush1.bf16.msra.mxu1 %v1122_v50  ;;  %1032 = vmatpush3.bf16.msra.mxu0 %v1125_v51 }
 0x121   :  { %652 = vmatprep.subr.bf16.mxu1 %v1128_v53  ;;  %1033 = vmatprep.subr.bf16.mxu0 %v1276_v0 }
 0x122   :  { %682 = vmatprep.mubr.bf16.mxu1 %v1278_v42  ;;  %1047 = vmatprep.mubr.msk.bf16.mxu0 %vm1277_vm0, %v1276_v0 }
 0x124   :  { %653 = vmatpush1.bf16.msra.mxu1 %v1126_v55  ;;  %1034 = vmatpush3.bf16.msra.mxu0 %v1129_v56 }
 0x125   :  { %654 = vmatprep.subr.bf16.mxu1 %v1132_v57  ;;  %1035 = vmatprep.subr.bf16.mxu0 %v1276_v0 }
 0x128   :  { %655 = vmatpush1.bf16.msra.mxu1 %v1130_v58  ;;  %1036 = vmatpush3.bf16.msra.mxu0 %v1133_v59 }
 0x129   :  { %656 = vmatprep.subr.bf16.mxu1 %v1136_v60  ;;  %1037 = vmatprep.subr.bf16.mxu0 %v1276_v0  ;;  %v889_v60 = vlaneseq }
 0x12c   :  { %657 = vmatpush1.bf16.msra.mxu1 %v1134_v61  ;;  %1038 = vmatpush3.bf16.msra.mxu0 %v1137_v62  ;;  %v890_v61 = vshrl.u32 %v889_v60, 7 }
 0x12d   :  { %658 = vmatprep.subr.bf16.mxu1 %v1140_v63  ;;  %1039 = vmatprep.subr.bf16.mxu0 %v1276_v0 }
 0x12e   :  { %v891_v62 = vsub.s32 0, %v890_v61  ;;  %v895_v63 = vsub.s32 1, %v890_v61 }
 0x130   :  { %659 = vmatpush1.bf16.msra.mxu1 %v1138_v1  ;;  %1040 = vmatpush3.bf16.msra.mxu0 %v1141_v2  ;;  %v887_v1 = vld [vmem:[%s1397_s8] sm:$0x3] }
 0x131   :  { %1041 = vmatprep.subr.bf16.mxu0 %v1276_v0  ;;  %660 = vmatprep.subr.bf16.mxu1 %v1144_v3 }
 0x134   :  { %661 = vmatpush1.bf16.msra.mxu1 %v1142_v4  ;;  %1042 = vmatpush3.bf16.msra.mxu0 %v1145_v5 }
 0x135   :  { %1043 = vmatprep.subr.bf16.mxu0 %v1276_v0  ;;  %662 = vmatprep.subr.bf16.mxu1 %v1148_v6  ;;  %v892_v6 = vrot.slane %v887_v1, %v891_v62 }
 0x138   :  { %663 = vmatpush1.bf16.msra.mxu1 %v1146_v7  ;;  %1044 = vmatpush3.bf16.msra.mxu0 %v1149_v8  ;;  %v896_v7 = vrot.slane %v887_v1, %v895_v63 }
 0x139   :  { %1045 = vmatprep.subr.bf16.mxu0 %v1276_v0  ;;  %664 = vmatprep.subr.bf16.mxu1 %v1152_v9 }
 0x13c   :  { %665 = vmatpush1.bf16.msra.mxu1 %v1150_v10  ;;  %1046 = vmatpush3.bf16.msra.mxu0 %v1153_v11 }
 0x13d   :  { %842 = vmatprep.subr.bf16.mxu1 %v1156_v12 }
 0x1df   :  { %v428_v14 = vpop.f32.mrf.mxu1  ;;  %v1373_v15 = vpop.f32.mrf.mxu0 }
 0x1e0   :  { %v483_v16 = vadd.f32 %v951_v13, %v428_v14 }
 0x1e1   :  { %v430_v17 = vpop.f32.mrf.mxu1  ;;  %v1375_v18 = vpop.f32.mrf.mxu0 }
 0x1e2   :  { %v484_v19 = vadd.f32 3.0, %v483_v16 }
 0x1e3   :  { %v432_v0 = vpop.f32.mrf.mxu1  ;;  %v473_v20 = vpop.f32.mrf.mxu0 }
 0x1e4   :  { %v485_v21 = vmax.f32 %v484_v19, 0.0 }
 0x1e5   :  { %v433_v22 = vpop.f32.mrf.mxu1  ;;  %v474_v23 = vpop.f32.mrf.mxu0 }
 0x1e6   :  { %v486_v24 = vmin.f32 %v485_v21, 6.0 }
 0x1e8   :  { %v487_v25 = vmul.f32 0.16666667, %v486_v24 }
 0x1ea   :  { %v488_v26 = vmul.f32 %v487_v25, %v483_v16 }
 0x1ec   :  { %v489_v28 = vpack.c.bf16 %v488_v26, %v488_v26 }
 0x1ee   :  { %683 = vmatmul.mubr.bf16.vlgmr.msra.gmra.mxu1 %v489_v28  ;;  %1048 = vmatmul.mubr.bf16.vlgmr.msra.gmra.mxu0 %v489_v28 }
 0x1ef   :  { %843 = vmatpush1.bf16.msra.mxu1 %v1154_v27  ;;  %874 = vmatprep.mubr.bf16.mxu1 %v1278_v42  ;;  %v1175_v42 = vld [vmem:[#allocation7] ss:$8 sps:$4 sm:$0xff]  }
 0x1f0   :  { %844 = vmatprep.subr.bf16.mxu1 %v1159_v29 }
 0x1f3   :  { %845 = vmatpush1.bf16.msra.mxu1 %v1157_v30 }
 0x1f4   :  { %846 = vmatprep.subr.bf16.mxu1 %v1162_v31 }
 0x1f7   :  { %847 = vmatpush1.bf16.msra.mxu1 %v1160_v32 }
 0x1f8   :  { %848 = vmatprep.subr.bf16.mxu1 %v1165_v33 }
 0x1fb   :  { %849 = vmatpush1.bf16.msra.mxu1 %v1163_v34 }
 0x1fc   :  { %850 = vmatprep.subr.bf16.mxu1 %v1168_v35 }
 0x1ff   :  { %851 = vmatpush1.bf16.msra.mxu1 %v1166_v36 }
 0x200   :  { %852 = vmatprep.subr.bf16.mxu1 %v1171_v37 }
 0x203   :  { %853 = vmatpush1.bf16.msra.mxu1 %v1169_v38 }
 0x204   :  { %854 = vmatprep.subr.bf16.mxu1 %v1174_v39 }
 0x207   :  { %855 = vmatpush1.bf16.msra.mxu1 %v1172_v40 }
 0x208   :  { %856 = vmatprep.subr.bf16.mxu1 %v1177_v41 }
 0x20b   :  { %857 = vmatpush1.bf16.msra.mxu1 %v1175_v42 }
 0x2ae   :  { %v684_v43 = vpop.f32.mrf.mxu1  ;;  %v725_v45 = vpop.f32.mrf.mxu0 }
 0x2af   :  { %v731_v46 = vadd.f32 %v684_v43, %v430_v17  ;;  %v884_v4 = vadd.f32 %v725_v45, %v1375_v18 }
 0x2b0   :  { %v686_v47 = vpop.f32.mrf.mxu1  ;;  %v1049_v48 = vpop.f32.mrf.mxu0 }
 0x2b1   :  { %v739_v49 = vadd.f32 %v976_v44, %v731_v46  ;;  %v883_v2 = vadd.f32 %v686_v47, %v1373_v15 }
 0x2b2   :  { %v688_v50 = vpop.f32.mrf.mxu1  ;;  %v728_v51 = vpop.f32.mrf.mxu0 }
 0x2b3   :  { %v740_v52 = vadd.f32 3.0, %v739_v49 }
 0x2b4   :  { %v689_v53 = vpop.f32.mrf.mxu1  ;;  %v1050_v54 = vpop.f32.mrf.mxu0 }
 0x2b5   :  { %v741_v55 = vmax.f32 %v740_v52, 0.0 }
 0x2b7   :  { %v742_v56 = vmin.f32 %v741_v55, 6.0 }
 0x2b9   :  { %v743_v57 = vmul.f32 0.16666667, %v742_v56 }
 0x2bb   :  { %v744_v58 = vmul.f32 %v743_v57, %v739_v49 }
 0x2bd   :  { %v745_v59 = vpack.c.bf16 %v744_v58, %v744_v58 }
 0x2bf   :  { %875 = vmatmul.mubr.bf16.vlgmr.msra.gmra.mxu1 %v745_v59 }
 0x37f   :  { %v876_v3 = vpop.f32.mrf.mxu1 }
 0x380   :  { %v885_v5 = vadd.f32 %v883_v2, %v876_v3 }
 0x381   :  { %v878_v8 = vpop.f32.mrf.mxu1 }
 0x382   :  { %v886_v9 = vadd.f32 %v884_v4, %v878_v8  ;;  %v899_v11 = vadd.f32 %v892_v6, %v885_v5 }
 0x383   :  { %v880_v10 = vpop.f32.mrf.mxu1 }
 0x384   :  { %v900_v12 = vadd.f32 %v896_v7, %v886_v9 }
 0x385   :  { %v881_v13 = vpop.f32.mrf.mxu1 }
 0x386   :  { %v901_v14 = vmin.f32 %v899_v11, %v900_v12 }
 0x388   :  { %902 = vst [vmem:[%s1398_s9] sm:$0xff] %v901_v14 }
 0x389   :  { %907 = vsyncpa [#allocation3], 1 }
 0x38a   :  { %908 = vsyncpa [#allocation5], 1 }
 0x38b   :  { %909 = vsyncpa [#allocation8], 1 }

</bundles_post_ra>
